<compile_context>
chip_gen: v7x
topology: tpu7x:2x2x1
jax: 0.10.0
libtpu: 0.0.40
codegen_flags: <defaults>
</compile_context>

<pallas_src>
import functools
import math

import jax
import jax.numpy as jnp
from jax.experimental import pallas as pl
from jax.experimental.pallas import tpu as pltpu

BN_SCALE = 1.0 / math.sqrt(1.0 + 1e-5)   # eval BN with default running stats


def _pick_rows(H):
    for th in (16, 8):
        if H % th == 0:
            return th
    return H


# ----------------------------------------------------------------------------
# GEMM kernel (bf16 operands, f32 accumulate, fused bias + ReLU, bf16 out)
# ----------------------------------------------------------------------------
def _matmul_kernel(a_ref, w_ref, b_ref, o_ref, *, relu):
    acc = jnp.dot(a_ref[...], w_ref[...], preferred_element_type=jnp.float32)
    acc = acc + b_ref[...]
    if relu:
        acc = jnp.maximum(acc, 0.0)
    o_ref[...] = acc.astype(o_ref.dtype)


@functools.lru_cache(maxsize=None)
def _matmul_fn(M, K, N, relu, tm, out_dtype_name):
    return pl.pallas_call(
        functools.partial(_matmul_kernel, relu=relu),
        out_shape=jax.ShapeDtypeStruct((M, N), jnp.dtype(out_dtype_name)),
        grid=(pl.cdiv(M, tm),),
        in_specs=[pl.BlockSpec((tm, K), lambda i: (i, 0)),
                  pl.BlockSpec((K, N), lambda i: (0, 0)),
                  pl.BlockSpec((1, N), lambda i: (0, 0))],
        out_specs=pl.BlockSpec((tm, N), lambda i: (i, 0)),
        compiler_params=pltpu.CompilerParams(
            dimension_semantics=("parallel",)),
    )


def matmul_bias_act(a, w, bias, relu=False, out_dtype=jnp.bfloat16):
    M, K = a.shape
    N = w.shape[1]
    tm = M if M <= 512 else 512
    return _matmul_fn(M, K, N, bool(relu), tm, jnp.dtype(out_dtype).name)(
        a.astype(jnp.bfloat16), w.astype(jnp.bfloat16),
        bias.reshape(1, N).astype(jnp.float32))


# ----------------------------------------------------------------------------
# Fused 3x3 Conv2d (stride 1, dilation d): haloed tile + 9 shifted matmuls
# ----------------------------------------------------------------------------
def _conv2d_fused_kernel(*refs, th, Wo, Cin, Cout, dil, relu, has_res):
    x_ref, w_ref, b_ref = refs[0], refs[1], refs[2]
    if has_res:
        res_ref, o_ref = refs[3], refs[4]
    else:
        o_ref = refs[3]
    acc = jnp.zeros((th * Wo, Cout), jnp.float32)
    for t in range(9):
        i, j = t // 3, t % 3
        xs = x_ref[0, 0, i * dil:i * dil + th, j * dil:j * dil + Wo, :]
        acc = acc + jnp.dot(xs.reshape(th * Wo, Cin), w_ref[t],
                            preferred_element_type=jnp.float32)
    out = acc + b_ref[...]
    if has_res:
        out = out + res_ref[0, 0].reshape(th * Wo, Cout).astype(jnp.float32)
    if relu:
        out = jnp.maximum(out, 0.0)
    o_ref[0, 0] = out.reshape(th, Wo, Cout).astype(o_ref.dtype)


@functools.lru_cache(maxsize=None)
def _conv2d_fused_fn(B, nH, th, Wo, Cin, Cout, dil, relu, has_res):
    Hh = th + 2 * dil
    Wp = Wo + 2 * dil
    in_specs = [
        pl.BlockSpec((1, 1, Hh, Wp, Cin), lambda b, i: (b, i, 0, 0, 0)),
        pl.BlockSpec((9, Cin, Cout), lambda b, i: (0, 0, 0)),
        pl.BlockSpec((1, Cout), lambda b, i: (0, 0)),
    ]
    if has_res:
        in_specs.append(pl.BlockSpec((1, 1, th, Wo, Cout),
                                     lambda b, i: (b, i, 0, 0, 0)))
    return pl.pallas_call(
        functools.partial(_conv2d_fused_kernel, th=th, Wo=Wo, Cin=Cin,
                          Cout=Cout, dil=dil, relu=relu, has_res=has_res),
        out_shape=jax.ShapeDtypeStruct((B, nH, th, Wo, Cout), jnp.bfloat16),
        grid=(B, nH),
        in_specs=in_specs,
        out_specs=pl.BlockSpec((1, 1, th, Wo, Cout),
                               lambda b, i: (b, i, 0, 0, 0)),
        compiler_params=pltpu.CompilerParams(
            dimension_semantics=("parallel", "parallel")),
    )


def conv2d_fused(x, p, dil=1, relu=True, residual=None):
    B, H, W, Cin = x.shape
    Cout = p['wm'].shape[-1]
    th = H if H <= 64 else 16
    nH = pl.cdiv(H, th)
    Hpad = nH * th
    Wpad = W if W % 8 == 0 else W + (8 - W % 8)
    wextra = Wpad - W
    xp = jnp.pad(x.astype(jnp.bfloat16),
                 ((0, 0), (dil, dil + (Hpad - H)), (dil, dil + wextra), (0, 0)))
    if nH == 1:
        xh = xp[:, None]
    else:
        xh = jnp.stack([xp[:, i * th:i * th + th + 2 * dil]
                        for i in range(nH)], axis=1)
    args = [xh, p['wm'], p['b'].reshape(1, Cout)]
    has_res = residual is not None
    if has_res:
        r = residual.astype(jnp.bfloat16)
        r = jnp.pad(r, ((0, 0), (0, Hpad - H), (0, wextra), (0, 0)))
        args.append(r.reshape(B, nH, th, Wpad, Cout))
    out = _conv2d_fused_fn(B, nH, th, Wpad, Cin, Cout, dil, bool(relu),
                           has_res)(*args)
    out = out.reshape(B, Hpad, Wpad, Cout)
    if Hpad != H or Wpad != W:
        out = out[:, :H, :W, :]
    return out


# ----------------------------------------------------------------------------
# Fused 3x3x3 Conv3d stride 1: kd grid axis + 9 in-plane shifted matmuls
# ----------------------------------------------------------------------------
def _conv3d_fused_kernel(*refs, Ho, Wo, Cin, Cout, relu, has_res):
    x_ref, w_ref, b_ref = refs[0], refs[1], refs[2]
    if has_res:
        res_ref, o_ref, acc_ref = refs[3], refs[4], refs[5]
    else:
        o_ref, acc_ref = refs[3], refs[4]
    a = pl.program_id(2)

    @pl.when(a == 0)
    def _():
        acc_ref[...] = jnp.zeros_like(acc_ref)

    for t in range(9):
        i, j = t // 3, t % 3
        xs = x_ref[0, 0, i:i + Ho, j:j + Wo, :]
        acc_ref[...] += jnp.dot(xs.reshape(Ho * Wo, Cin), w_ref[a * 9 + t],
                                preferred_element_type=jnp.float32)

    @pl.when(a == pl.num_programs(2) - 1)
    def _():
        out = acc_ref[...] + b_ref[...]
        if has_res:
            out = out + res_ref[0, 0].reshape(Ho * Wo, Cout).astype(jnp.float32)
        if relu:
            out = jnp.maximum(out, 0.0)
        o_ref[0, 0] = out.reshape(Ho, Wo, Cout).astype(o_ref.dtype)


@functools.lru_cache(maxsize=None)
def _conv3d_fused_fn(B, D, H, W, Cin, Cout, relu, has_res, out_dtype_name):
    Hp, Wp = H + 2, W + 2
    in_specs = [
        pl.BlockSpec((1, 1, Hp, Wp, Cin), lambda b, d, a: (b, d + a, 0, 0, 0)),
        pl.BlockSpec((27, Cin, Cout), lambda b, d, a: (0, 0, 0)),
        pl.BlockSpec((1, Cout), lambda b, d, a: (0, 0)),
    ]
    if has_res:
        in_specs.append(pl.BlockSpec((1, 1, H, W, Cout),
                                     lambda b, d, a: (b, d, 0, 0, 0)))
    return pl.pallas_call(
        functools.partial(_conv3d_fused_kernel, Ho=H, Wo=W, Cin=Cin,
                          Cout=Cout, relu=relu, has_res=has_res),
        out_shape=jax.ShapeDtypeStruct((B, D, H, W, Cout),
                                       jnp.dtype(out_dtype_name)),
        grid=(B, D, 3),
        in_specs=in_specs,
        out_specs=pl.BlockSpec((1, 1, H, W, Cout),
                               lambda b, d, a: (b, d, 0, 0, 0)),
        scratch_shapes=[pltpu.VMEM((H * W, Cout), jnp.float32)],
        compiler_params=pltpu.CompilerParams(
            dimension_semantics=("parallel", "parallel", "arbitrary")),
    )


def conv3d_fused(x, p, relu, residual=None, out_dtype=jnp.bfloat16):
    B, D, H, W, Cin = x.shape
    Cout = p['wm'].shape[-1]
    Wpad = W if W % 8 == 0 else W + (8 - W % 8)
    wextra = Wpad - W
    xp = jnp.pad(x.astype(jnp.bfloat16),
                 ((0, 0), (1, 1), (1, 1), (1, 1 + wextra), (0, 0)))
    wm = p['wm'].reshape(27, Cin, Cout)
    args = [xp, wm, p['b'].reshape(1, Cout)]
    has_res = residual is not None
    if has_res:
        r = residual.astype(jnp.bfloat16)
        if wextra:
            r = jnp.pad(r, ((0, 0), (0, 0), (0, 0), (0, wextra), (0, 0)))
        args.append(r)
    out = _conv3d_fused_fn(B, D, H, Wpad, Cin, Cout, bool(relu), has_res,
                           jnp.dtype(out_dtype).name)(*args)
    if wextra:
        out = out[:, :, :, :W, :]
    return out


# ----------------------------------------------------------------------------
# Conv3d 3x3x3 stride 2: kd-tap accumulation GEMM (im2col only on (kh,kw))
# ----------------------------------------------------------------------------
def _conv3d_tap_kernel(a_ref, w_ref, b_ref, o_ref, acc_ref, *, relu, ntap):
    t = pl.program_id(3)

    @pl.when(t == 0)
    def _():
        acc_ref[...] = jnp.zeros_like(acc_ref)

    acc_ref[...] += jnp.dot(a_ref[0, 0], w_ref[t],
                            preferred_element_type=jnp.float32)

    @pl.when(t == ntap - 1)
    def _():
        out = acc_ref[...] + b_ref[...]
        if relu:
            out = jnp.maximum(out, 0.0)
        o_ref[0, 0] = out.astype(o_ref.dtype)


@functools.lru_cache(maxsize=None)
def _conv3d_tap_fn(B, Dp, Do, Mo, K, Cout, stride, relu, ntap):
    tm = Mo if Mo <= 512 else 512
    return pl.pallas_call(
        functools.partial(_conv3d_tap_kernel, relu=relu, ntap=ntap),
        out_shape=jax.ShapeDtypeStruct((B, Do, Mo, Cout), jnp.bfloat16),
        grid=(B, Do, pl.cdiv(Mo, tm), ntap),
        in_specs=[
            pl.BlockSpec((1, 1, tm, K),
                         lambda b, d, i, a: (b, stride * d + a, i, 0)),
            pl.BlockSpec((ntap, K, Cout), lambda b, d, i, a: (0, 0, 0)),
            pl.BlockSpec((1, Cout), lambda b, d, i, a: (0, 0)),
        ],
        out_specs=pl.BlockSpec((1, 1, tm, Cout),
                               lambda b, d, i, a: (b, d, i, 0)),
        scratch_shapes=[pltpu.VMEM((tm, Cout), jnp.float32)],
        compiler_params=pltpu.CompilerParams(
            dimension_semantics=("parallel", "parallel", "parallel",
                                 "arbitrary")),
    )


def conv3d_s2(x, p, relu):
    # TODO(synk): stride-2 3D convs keep a small (2.25x) in-plane im2col; a
    # fully fused phase-decomposed kernel would remove even that.
    B, D, H, W, Cin = x.shape
    Cout = p['wm'].shape[-1]
    xp = jnp.pad(x.astype(jnp.bfloat16),
                 ((0, 0), (1, 1), (1, 1), (1, 1), (0, 0)))
    Dp = D + 2
    Do = (D - 1) // 2 + 1
    Ho = (H - 1) // 2 + 1
    Wo = (W - 1) // 2 + 1
    cols = []
    for i in range(3):
        for j in range(3):
            cols.append(xp[:, :, i:i + 2 * (Ho - 1) + 1:2,
                           j:j + 2 * (Wo - 1) + 1:2, :])
    patches = jnp.concatenate(cols, axis=-1).reshape(B, Dp, Ho * Wo, 9 * Cin)
    wm = p['wm'].reshape(3, 9 * Cin, Cout)
    out = _conv3d_tap_fn(B, Dp, Do, Ho * Wo, 9 * Cin, Cout, 2, bool(relu), 3)(
        patches, wm, p['b'].reshape(1, Cout))
    return out.reshape(B, Do, Ho, Wo, Cout)


# ----------------------------------------------------------------------------
# 1x1 convs (pure GEMM) and stride-2 3x3 conv2d (small im2col)
# ----------------------------------------------------------------------------
def conv1x1(x, p, relu=False):
    shape = x.shape
    Cout = p['wmat'].shape[-1]
    out = matmul_bias_act(x.reshape(-1, shape[-1]), p['wmat'], p['b'],
                          relu=relu)
    return out.reshape(shape[:-1] + (Cout,))


def conv2d_s2_im2col(x, p, relu):
    B, H, W, Cin = x.shape
    Cout = p['wm'].shape[-1]
    xp = jnp.pad(x.astype(jnp.bfloat16), ((0, 0), (1, 1), (1, 1), (0, 0)))
    Ho = (H - 1) // 2 + 1
    Wo = (W - 1) // 2 + 1
    cols = []
    for i in range(3):
        for j in range(3):
            cols.append(xp[:, i:i + 2 * (Ho - 1) + 1:2,
                           j:j + 2 * (Wo - 1) + 1:2, :])
    patches = jnp.concatenate(cols, axis=-1).reshape(B * Ho * Wo, 9 * Cin)
    wmat = p['wm'].reshape(9 * Cin, Cout)
    out = matmul_bias_act(patches, wmat, p['b'], relu=relu)
    return out.reshape(B, Ho, Wo, Cout)


# ----------------------------------------------------------------------------
# Elementwise add / softmax kernels
# ----------------------------------------------------------------------------
def _add_kernel(a_ref, b_ref, o_ref, *, relu):
    s = a_ref[...].astype(jnp.float32) + b_ref[...].astype(jnp.float32)
    if relu:
        s = jnp.maximum(s, 0.0)
    o_ref[...] = s.astype(o_ref.dtype)


@functools.lru_cache(maxsize=None)
def _add_fn(M, C, relu, tm):
    return pl.pallas_call(
        functools.partial(_add_kernel, relu=relu),
        out_shape=jax.ShapeDtypeStruct((M, C), jnp.bfloat16),
        grid=(pl.cdiv(M, tm),),
        in_specs=[pl.BlockSpec((tm, C), lambda i: (i, 0))] * 2,
        out_specs=pl.BlockSpec((tm, C), lambda i: (i, 0)),
        compiler_params=pltpu.CompilerParams(
            dimension_semantics=("parallel",)),
    )


def add_act(a, b, relu=False):
    shape = a.shape
    a2 = a.reshape(-1, shape[-1])
    b2 = b.reshape(-1, shape[-1])
    M, C = a2.shape
    tm = M if M <= 512 else 512
    return _add_fn(M, C, bool(relu), tm)(a2, b2).reshape(shape)


def _softmax_d_kernel(x_ref, o_ref):
    x = x_ref[0]
    m = jnp.max(x, axis=0, keepdims=True)
    e = jnp.exp(x - m)
    o_ref[0] = e / jnp.sum(e, axis=0, keepdims=True)


@functools.lru_cache(maxsize=None)
def _softmax_d_fn(B, D, H, W):
    return pl.pallas_call(
        _softmax_d_kernel,
        out_shape=jax.ShapeDtypeStruct((B, D, H, W), jnp.float32),
        grid=(B,),
        in_specs=[pl.BlockSpec((1, D, H, W), lambda b: (b, 0, 0, 0))],
        out_specs=pl.BlockSpec((1, D, H, W), lambda b: (b, 0, 0, 0)),
        compiler_params=pltpu.CompilerParams(
            dimension_semantics=("parallel",)),
    )


def softmax_over_disp(x):
    B, D, H, W = x.shape
    return _softmax_d_fn(B, D, H, W)(x.astype(jnp.float32))


def _softmax_disp_kernel(x_ref, o_ref):
    x = x_ref[...]
    x = x - jnp.max(x, axis=-1, keepdims=True)
    e = jnp.exp(x)
    p = e / jnp.sum(e, axis=-1, keepdims=True)   # exact div (regression accuracy)
    disp = jax.lax.broadcasted_iota(jnp.float32, p.shape, 1)
    # TODO(synk): (tm,1) output is lane-sparse; a lane-dense relayout is skipped.
    o_ref[...] = jnp.sum(p * disp, axis=-1, keepdims=True)


@functools.lru_cache(maxsize=None)
def _softmax_disp_fn(M, D, tm):
    return pl.pallas_call(
        _softmax_disp_kernel,
        out_shape=jax.ShapeDtypeStruct((M, 1), jnp.float32),
        grid=(pl.cdiv(M, tm),),
        in_specs=[pl.BlockSpec((tm, D), lambda i: (i, 0))],
        out_specs=pl.BlockSpec((tm, 1), lambda i: (i, 0)),
        compiler_params=pltpu.CompilerParams(
            dimension_semantics=("parallel",)),
    )


def softmax_disparity(x):
    M, D = x.shape
    tm = M if M <= 512 else 512
    return _softmax_disp_fn(M, D, tm)(x)


# ----------------------------------------------------------------------------
# Group-wise correlation volume (in-VMEM disparity shift, single bf16 matmul)
# ----------------------------------------------------------------------------
def _gwc_kernel(fl_ref, frp_ref, g_ref, o_ref, *, W, D, th, fuse):
    d = pl.program_id(2)
    start = D - d
    g = g_ref[...]
    if fuse:
        prod = fl_ref[0] * frp_ref[0, :, pl.ds(start, W), :]
        res = jnp.dot(prod.reshape(th * W, prod.shape[-1]), g,
                      preferred_element_type=jnp.float32)
        o_ref[0, 0] = res.reshape(th, W, -1).astype(o_ref.dtype)
    else:
        for t in range(th):
            prod = fl_ref[0, t] * frp_ref[0, t, pl.ds(start, W), :]
            o_ref[0, 0, t] = jnp.dot(
                prod, g, preferred_element_type=jnp.float32).astype(o_ref.dtype)


@functools.lru_cache(maxsize=None)
def _gwc_fn(B, H, W, C, G, D, th, fuse):
    return pl.pallas_call(
        functools.partial(_gwc_kernel, W=W, D=D, th=th, fuse=fuse),
        out_shape=jax.ShapeDtypeStruct((B, D, H, W, G), jnp.bfloat16),
        grid=(B, H // th, D),
        in_specs=[
            pl.BlockSpec((1, th, W, C), lambda b, i, d: (b, i, 0, 0)),
            pl.BlockSpec((1, th, D + W, C), lambda b, i, d: (b, i, 0, 0)),
            pl.BlockSpec((C, G), lambda b, i, d: (0, 0)),
        ],
        out_specs=pl.BlockSpec((1, 1, th, W, G),
                               lambda b, i, d: (b, d, i, 0, 0)),
        compiler_params=pltpu.CompilerParams(
            dimension_semantics=("parallel", "parallel", "parallel")),
    )


def build_gwc_volume(fl, fr, D, num_groups):
    B, H, W, C = fl.shape
    cpg = C // num_groups
    gmat = ((jnp.arange(C)[:, None] // cpg == jnp.arange(num_groups)[None, :])
            .astype(jnp.float32) / cpg).astype(jnp.bfloat16)
    frp = jnp.pad(fr.astype(jnp.bfloat16), ((0, 0), (0, 0), (D, 0), (0, 0)))
    th = _pick_rows(H)
    return _gwc_fn(B, H, W, C, num_groups, D, th, W % 8 == 0)(
        fl.astype(jnp.bfloat16), frp, gmat)


# ----------------------------------------------------------------------------
# Fused grouped depthwise (1,3,3) "patch" convs with per-group dilation
# ----------------------------------------------------------------------------
def _dwpatch_kernel(x_ref, w_ref, o_ref, *, groups_dil, H, W, P, hc):
    C = o_ref.shape[-1]
    for h0 in range(0, H, hc):
        acc = jnp.zeros((hc, W, C), jnp.float32)
        for g, dil in enumerate(groups_dil):
            for i in range(3):
                for j in range(3):
                    hs = P + h0 + (i - 1) * dil
                    ws = P + (j - 1) * dil
                    acc = acc + (x_ref[0, 0, hs:hs + hc, ws:ws + W, :]
                                 .astype(jnp.float32) * w_ref[g, i * 3 + j, :])
        o_ref[0, 0, h0:h0 + hc] = acc.astype(o_ref.dtype)


@functools.lru_cache(maxsize=None)
def _dwpatch_fn(B, D, H, W, C, P, groups_dil, hc):
    Hp, Wp = H + 2 * P, W + 2 * P
    ng = len(groups_dil)
    return pl.pallas_call(
        functools.partial(_dwpatch_kernel, groups_dil=groups_dil,
                          H=H, W=W, P=P, hc=hc),
        out_shape=jax.ShapeDtypeStruct((B, D, H, W, C), jnp.bfloat16),
        grid=(B, D),
        in_specs=[
            pl.BlockSpec((1, 1, Hp, Wp, C), lambda b, d: (b, d, 0, 0, 0)),
            pl.BlockSpec((ng, 9, C), lambda b, d: (0, 0, 0)),
        ],
        out_specs=pl.BlockSpec((1, 1, H, W, C), lambda b, d: (b, d, 0, 0, 0)),
        compiler_params=pltpu.CompilerParams(
            dimension_semantics=("parallel", "parallel")),
    )


def depthwise_patch_groups(x, w9, groups):
    """x: (B,D,H,W,C); w9: (9,C) per-channel 3x3 taps; groups: ((c0,c1,dil),...)."""
    # TODO(synk): 40-ch volume uses 40/128 lanes; packing 3 depth slices into
    # 120 lanes (review suggestion) is left out for shape-divisibility safety.
    B, D, H, W, C = x.shape
    P = max(g[2] for g in groups)
    xp = jnp.pad(x.astype(jnp.bfloat16),
                 ((0, 0), (0, 0), (P, P), (P, P), (0, 0)))
    wm = jnp.zeros((len(groups), 9, C), jnp.float32)
    for g, (c0, c1, dil) in enumerate(groups):
        wm = wm.at[g, :, c0:c1].set(w9[:, c0:c1])
    groups_dil = tuple(g[2] for g in groups)
    hc = 8 if H % 8 == 0 else H
    return _dwpatch_fn(B, D, H, W, C, P, groups_dil, hc)(xp, wm)


# ----------------------------------------------------------------------------
# Attention-weighted concat volume (shift + mask + attention multiply fused)
# ----------------------------------------------------------------------------
def _concat_vol_kernel(cl_ref, crp_ref, att_ref, o_ref, *, W, D, th):
    d = pl.program_id(2)
    start = D - d
    a = att_ref[0, 0][..., None]
    wid = jax.lax.broadcasted_iota(jnp.int32, (th, W, 1), 1)
    l = jnp.where(wid >= d, cl_ref[0].astype(jnp.float32), 0.0)
    r = crp_ref[0, :, pl.ds(start, W), :].astype(jnp.float32)
    o_ref[0, 0] = (jnp.concatenate([l, r], axis=-1) * a).astype(o_ref.dtype)


@functools.lru_cache(maxsize=None)
def _concat_vol_fn(B, H, W, C, D, th):
    return pl.pallas_call(
        functools.partial(_concat_vol_kernel, W=W, D=D, th=th),
        out_shape=jax.ShapeDtypeStruct((B, D, H, W, 2 * C), jnp.bfloat16),
        grid=(B, H // th, D),
        in_specs=[
            pl.BlockSpec((1, th, W, C), lambda b, i, d: (b, i, 0, 0)),
            pl.BlockSpec((1, th, D + W, C), lambda b, i, d: (b, i, 0, 0)),
            pl.BlockSpec((1, 1, th, W), lambda b, i, d: (b, d, i, 0)),
        ],
        out_specs=pl.BlockSpec((1, 1, th, W, 2 * C),
                               lambda b, i, d: (b, d, i, 0, 0)),
        compiler_params=pltpu.CompilerParams(
            dimension_semantics=("parallel", "parallel", "parallel")),
    )


def build_concat_volume_weighted(cl, cr, D, att_sm):
    B, H, W, C = cl.shape
    crp = jnp.pad(cr.astype(jnp.bfloat16), ((0, 0), (0, 0), (D, 0), (0, 0)))
    th = _pick_rows(H)
    return _concat_vol_fn(B, H, W, C, D, th)(
        cl.astype(jnp.bfloat16), crp, att_sm.astype(jnp.float32))


# ----------------------------------------------------------------------------
# Block-wise MHSA (batched groups per grid step, bf16 operands)
# ----------------------------------------------------------------------------
def _attn_kernel(q_ref, k_ref, v_ref, o_ref, *, scale):
    q = q_ref[...]
    k = k_ref[...]
    v = v_ref[...]
    s = jnp.einsum('gtd,gsd->gts', q, k,
                   preferred_element_type=jnp.float32) * scale
    s = s - jnp.max(s, axis=-1, keepdims=True)
    p = jnp.exp(s)
    p = p * pl.reciprocal(jnp.sum(p, axis=-1, keepdims=True), approx=True)
    o = jnp.einsum('gts,gsd->gtd', p.astype(v.dtype), v,
                   preferred_element_type=jnp.float32)
    o_ref[...] = o.astype(o_ref.dtype)


@functools.lru_cache(maxsize=None)
def _attn_fn(N, T, Dh, scale, gt):
    return pl.pallas_call(
        functools.partial(_attn_kernel, scale=scale),
        out_shape=jax.ShapeDtypeStruct((N, T, Dh), jnp.bfloat16),
        grid=(pl.cdiv(N, gt),),
        in_specs=[pl.BlockSpec((gt, T, Dh), lambda i: (i, 0, 0))] * 3,
        out_specs=pl.BlockSpec((gt, T, Dh), lambda i: (i, 0, 0)),
        compiler_params=pltpu.CompilerParams(
            dimension_semantics=("parallel",)),
    )


# ----------------------------------------------------------------------------
# ConvTranspose3d(k=3,s=2,p=1,op=1)+BN: phase GEMMs + one reassembly pass
# ----------------------------------------------------------------------------
def conv_transpose3d_bn(x, p):
    wm = p['wm']                                  # (3,3,3,Cin,Cout) bf16
    B, D, H, W, Cin = x.shape
    Cout = wm.shape[-1]
    xp = jnp.pad(x.astype(jnp.bfloat16),
                 ((0, 0), (0, 1), (0, 1), (0, 1), (0, 0)))
    even = ((1, 0),)                              # (kernel tap, input offset)
    odd = ((0, 1), (2, 0))
    phases = []
    for pd in (0, 1):
        for ph in (0, 1):
            for pw in (0, 1):
                taps = [(a, oa, bt, ob, c, oc)
                        for a, oa in (even if pd == 0 else odd)
                        for bt, ob in (even if ph == 0 else odd)
                        for c, oc in (even if pw == 0 else odd)]
                cols = [xp[:, oa:oa + D, ob:ob + H, oc:oc + W, :]
                        for a, oa, bt, ob, c, oc in taps]
                patches = jnp.concatenate(cols, axis=-1).reshape(
                    B * D * H * W, len(taps) * Cin)
                wmat = jnp.concatenate(
                    [wm[a, bt, c] for a, oa, bt, ob, c, oc in taps], axis=0)
                phases.append(matmul_bias_act(patches, wmat, p['b'])
                              .reshape(B, D, H, W, Cout))
    ph_arr = jnp.stack(phases, axis=4).reshape(B, D, H, W, 2, 2, 2, Cout)
    out = jnp.transpose(ph_arr, (0, 1, 4, 2, 5, 3, 6, 7))
    return out.reshape(B, 2 * D, 2 * H, 2 * W, Cout)


# ----------------------------------------------------------------------------
# Parameter generation (deterministic, synthetic — no checkpoint).  Weights are
# generated directly in their GEMM layout, BN-folded and pre-cast to bf16.
# ----------------------------------------------------------------------------
class PGen:
    def __init__(self, seed=0):
        self._key = jax.random.PRNGKey(seed)

    def _k(self):
        self._key, k = jax.random.split(self._key)
        return k

    def normal(self, shape, std):
        return jax.random.normal(self._k(), shape, jnp.float32) * std


def p_conv2d3(pg, cin, cout, bn=True):
    w = pg.normal((9, cin, cout), math.sqrt(2.0 / (9.0 * cout)))
    if bn:
        w = w * BN_SCALE
    return {'wm': w.astype(jnp.bfloat16), 'b': jnp.zeros((cout,), jnp.float32)}


def p_conv1x1(pg, cin, cout, bn=True):
    w = pg.normal((cin, cout), math.sqrt(2.0 / cout))
    if bn:
        w = w * BN_SCALE
    return {'wmat': w.astype(jnp.bfloat16), 'b': jnp.zeros((cout,), jnp.float32)}


def p_conv3d3(pg, cin, cout, bn=True):
    w = pg.normal((3, 9, cin, cout), math.sqrt(2.0 / (27.0 * cout)))
    if bn:
        w = w * BN_SCALE
    return {'wm': w.astype(jnp.bfloat16), 'b': jnp.zeros((cout,), jnp.float32)}


def p_deconv3d(pg, cin, cout):
    w = pg.normal((3, 3, 3, cin, cout), 1.0 / math.sqrt(27.0 * cin)) * BN_SCALE
    return {'wm': w.astype(jnp.bfloat16), 'b': jnp.zeros((cout,), jnp.float32)}


def p_dw(pg, c):
    return pg.normal((9, c), math.sqrt(2.0 / (9.0 * c)))


# ----------------------------------------------------------------------------
# Feature extraction (PSMNet-style BasicBlocks)
# ----------------------------------------------------------------------------
def make_layer(pg, inplanes, planes, blocks, stride, pad, dilation):
    layers = []
    down = None
    if stride != 1 or inplanes != planes:
        down = p_conv1x1(pg, inplanes, planes)
    layers.append(dict(c1=p_conv2d3(pg, inplanes, planes),
                       c2=p_conv2d3(pg, planes, planes),
                       down=down, stride=stride, dil=dilation))
    for _ in range(1, blocks):
        layers.append(dict(c1=p_conv2d3(pg, planes, planes),
                           c2=p_conv2d3(pg, planes, planes),
                           down=None, stride=1, dil=dilation))
    return layers, planes


def apply_basic_block(b, x):
    dil = b['dil']
    if b['stride'] == 1:
        out = conv2d_fused(x, b['c1'], dil=dil, relu=True)
        sc_in = x
    else:
        out = conv2d_s2_im2col(x, b['c1'], relu=True)
        sc_in = x[:, ::b['stride'], ::b['stride'], :]
    sc = sc_in if b['down'] is None else conv1x1(sc_in, b['down'], relu=False)
    return conv2d_fused(out, b['c2'], dil=dil, relu=False, residual=sc)


def apply_layer(layers, x):
    for b in layers:
        x = apply_basic_block(b, x)
    return x


def make_feature_extraction(pg):
    fe = {}
    fe['firstconv'] = [p_conv2d3(pg, 3, 32), p_conv2d3(pg, 32, 32),
                       p_conv2d3(pg, 32, 32)]
    inpl = 32
    fe['layer1'], inpl = make_layer(pg, inpl, 32, 3, 1, 1, 1)
    fe['layer2'], inpl = make_layer(pg, inpl, 64, 16, 2, 1, 1)
    fe['layer3'], inpl = make_layer(pg, inpl, 128, 3, 1, 1, 1)
    fe['layer4'], inpl = make_layer(pg, inpl, 128, 3, 1, 1, 2)
    return fe


def apply_feature_extraction(P, x):
    x = conv2d_s2_im2col(x, P['firstconv'][0], relu=True)
    x = conv2d_fused(x, P['firstconv'][1], dil=1, relu=True)
    x = conv2d_fused(x, P['firstconv'][2], dil=1, relu=True)
    x = apply_layer(P['layer1'], x)
    l2 = apply_layer(P['layer2'], x)
    l3 = apply_layer(P['layer3'], l2)
    l4 = apply_layer(P['layer4'], l3)
    return jnp.concatenate([l2, l3, l4], axis=-1)    # (B, H/4, W/4, 320)


# ----------------------------------------------------------------------------
# Attention block + hourglass
# ----------------------------------------------------------------------------
def make_attention(pg, C, heads):
    # TODO(synk): attention_block source is not shipped with the module; this
    # follows the ACVNet reference (block-wise MHSA + final projection).
    return dict(qkv_w=pg.normal((C, 3 * C), 1.0 / math.sqrt(C)).astype(jnp.bfloat16),
                qkv_b=jnp.zeros((3 * C,), jnp.float32),
                fin_w=pg.normal((C, C), math.sqrt(2.0 / C)).astype(jnp.bfloat16),
                fin_b=jnp.zeros((C,), jnp.float32),
                heads=heads)


def apply_attention(p, x):
    B, D, H, W, C = x.shape
    bd, bh, bw = 4, 4, 4
    heads = p['heads']
    hd = C // heads
    pd_, ph_, pw_ = (-D) % bd, (-H) % bh, (-W) % bw
    xp = jnp.pad(x, ((0, 0), (0, pd_), (0, ph_), (0, pw_), (0, 0)))
    d, h, w = D + pd_, H + ph_, W + pw_
    dg, hg, wg = d // bd, h // bh, w // bw
    G = dg * hg * wg
    T = bd * bh * bw
    xb = xp.reshape(B, dg, bd, hg, bh, wg, bw, C)
    xb = jnp.transpose(xb, (0, 1, 3, 5, 2, 4, 6, 7)).reshape(B * G * T, C)
    qkv = matmul_bias_act(xb, p['qkv_w'], p['qkv_b'])
    qkv = qkv.reshape(B, G, T, 3, heads, hd)
    qkv = jnp.transpose(qkv, (3, 0, 1, 4, 2, 5)).reshape(3, B * G * heads, T, hd)
    N = B * G * heads
    gt = min(N, 32)
    o = _attn_fn(N, T, hd, float(hd) ** -0.5, gt)(qkv[0], qkv[1], qkv[2])
    o = o.reshape(B, G, heads, T, hd)
    o = jnp.transpose(o, (0, 1, 3, 2, 4)).reshape(B * G * T, C)
    o = matmul_bias_act(o, p['fin_w'], p['fin_b'])
    o = o.reshape(B, dg, hg, wg, bd, bh, bw, C)
    o = jnp.transpose(o, (0, 1, 4, 2, 5, 3, 6, 7)).reshape(B, d, h, w, C)
    return o[:, :D, :H, :W, :]


def make_hourglass(pg, c):
    return dict(conv1=p_conv3d3(pg, c, 2 * c),
                conv2=p_conv3d3(pg, 2 * c, 2 * c),
                conv3=p_conv3d3(pg, 2 * c, 4 * c),
                conv4=p_conv3d3(pg, 4 * c, 4 * c),
                attn=make_attention(pg, 4 * c, 16),
                conv5=p_deconv3d(pg, 4 * c, 2 * c),
                conv6=p_deconv3d(pg, 2 * c, c),
                redir1=p_conv1x1(pg, c, c),
                redir2=p_conv1x1(pg, 2 * c, 2 * c))


def apply_hourglass(p, x):
    c1 = conv3d_s2(x, p['conv1'], relu=True)
    c2 = conv3d_fused(c1, p['conv2'], relu=True)
    c3 = conv3d_s2(c2, p['conv3'], relu=True)
    c4 = conv3d_fused(c3, p['conv4'], relu=True)
    c4 = apply_attention(p['attn'], c4)
    c5 = add_act(conv_transpose3d_bn(c4, p['conv5']),
                 conv1x1(c2, p['redir2'], relu=False), relu=True)
    c6 = add_act(conv_transpose3d_bn(c5, p['conv6']),
                 conv1x1(x, p['redir1'], relu=False), relu=True)
    return c6


# ----------------------------------------------------------------------------
# ACVNet
# ----------------------------------------------------------------------------
def make_acvnet(pg):
    P = {}
    P['fe'] = make_feature_extraction(pg)
    P['concatconv'] = dict(c1=p_conv2d3(pg, 320, 128),
                           c2=p_conv1x1(pg, 128, 32, bn=False))
    P['patch'] = p_dw(pg, 40)
    P['patch_l1'] = p_dw(pg, 8)
    P['patch_l2'] = p_dw(pg, 16)
    P['patch_l3'] = p_dw(pg, 16)
    P['dres1_att'] = [p_conv3d3(pg, 40, 32), p_conv3d3(pg, 32, 32)]
    P['dres2_att'] = make_hourglass(pg, 32)
    P['classif_att'] = dict(c1=p_conv3d3(pg, 32, 32),
                            c2=p_conv3d3(pg, 32, 1, bn=False))
    P['dres0'] = [p_conv3d3(pg, 64, 32), p_conv3d3(pg, 32, 32)]
    P['dres1'] = [p_conv3d3(pg, 32, 32), p_conv3d3(pg, 32, 32)]
    P['dres2'] = make_hourglass(pg, 32)
    P['dres3'] = make_hourglass(pg, 32)
    # classif0 / classif1 are training-only heads and unused in eval forward.
    P['classif2'] = dict(c1=p_conv3d3(pg, 32, 32),
                         c2=p_conv3d3(pg, 32, 1, bn=False))
    return P


def apply_concatconv(p, x):
    x = conv2d_fused(x, p['c1'], dil=1, relu=True)
    return conv1x1(x, p['c2'], relu=False)


def acvnet_forward(P, left, right, maxdisp):
    """Eval-mode forward (attn_weights_only=False) -> pred2 (B,H,W)."""
    B = left.shape[0]
    Himg, Wimg = left.shape[2], left.shape[3]
    l = jnp.transpose(left, (0, 2, 3, 1))
    r = jnp.transpose(right, (0, 2, 3, 1))
    fl = apply_feature_extraction(P['fe'], l)
    fr = apply_feature_extraction(P['fe'], r)
    D = maxdisp // 4

    gwc = build_gwc_volume(fl, fr, D, 40)                    # (B,D,H4,W4,40)
    gwc = depthwise_patch_groups(gwc, P['patch'], ((0, 40, 1),))
    w_l = jnp.concatenate([P['patch_l1'], P['patch_l2'], P['patch_l3']],
                          axis=1)                            # (9, 40)
    patch_volume = depthwise_patch_groups(
        gwc, w_l, ((0, 8, 1), (8, 24, 2), (24, 40, 3)))

    ca = conv3d_fused(patch_volume, P['dres1_att'][0], relu=True)
    ca = conv3d_fused(ca, P['dres1_att'][1], relu=False)
    ca = apply_hourglass(P['dres2_att'], ca)
    aw = conv3d_fused(ca, P['classif_att']['c1'], relu=True)
    att = conv3d_fused(aw, P['classif_att']['c2'], relu=False,
                       out_dtype=jnp.float32)[..., 0]        # (B,D,H4,W4)

    cfl = apply_concatconv(P['concatconv'], fl)
    cfr = apply_concatconv(P['concatconv'], fr)

    att_sm = softmax_over_disp(att)                          # softmax over D
    ac = build_concat_volume_weighted(cfl, cfr, D, att_sm)   # (B,D,H4,W4,64)

    cost0 = conv3d_fused(ac, P['dres0'][0], relu=True)
    cost0 = conv3d_fused(cost0, P['dres0'][1], relu=True)
    c = conv3d_fused(cost0, P['dres1'][0], relu=True)
    cost0 = conv3d_fused(c, P['dres1'][1], relu=False, residual=cost0)
    out1 = apply_hourglass(P['dres2'], cost0)
    out2 = apply_hourglass(P['dres3'], out1)

    c2 = conv3d_fused(out2, P['classif2']['c1'], relu=True)
    cost2 = conv3d_fused(c2, P['classif2']['c2'], relu=False,
                         out_dtype=jnp.float32)[..., 0]      # (B,D,H4,W4)

    # TODO(synk): F.upsample(mode='trilinear', align_corners=False) glue via
    # jax.image.resize (half-pixel linear sampling).
    cost_up = jax.image.resize(cost2, (B, maxdisp, Himg, Wimg),
                               method='trilinear')
    x = jnp.transpose(cost_up, (0, 2, 3, 1)).reshape(B * Himg * Wimg, maxdisp)
    pred = softmax_disparity(x)          # fused softmax + disparity regression
    return pred.reshape(B, Himg, Wimg)


# ----------------------------------------------------------------------------
if __name__ == "__main__":
    B, H, W = 1, 32, 64          # small shapes; dims divisible by 16
    maxdisp = 64                 # module default is 192; scaled down for demo

    key = jax.random.PRNGKey(0)
    k1, k2 = jax.random.split(key)
    left = jax.random.normal(k1, (B, 3, H, W), jnp.float32)   # NCHW like PyTorch
    right = jax.random.normal(k2, (B, 3, H, W), jnp.float32)

    params = make_acvnet(PGen(0))
    pred2 = acvnet_forward(params, left, right, maxdisp)
    pred2 = jax.block_until_ready(pred2)
    assert pred2.shape == (B, H, W)
    print("KERNEL_OK")
</pallas_src>

<mosaic_0001>
module attributes {stable_mosaic.version = 11 : i64} {
  func.func @_matmul_kernel(%arg0: i32, %arg1: memref<512x27xbf16, #tpu.memory_space<vmem>>, %arg2: memref<27x32xbf16, #tpu.memory_space<vmem>>, %arg3: memref<1x32xf32, #tpu.memory_space<vmem>>, %arg4: memref<512x32xbf16, #tpu.memory_space<vmem>>) attributes {dimension_semantics = [#tpu.dimension_semantics<parallel>], iteration_bounds = array<i64: 1>, scalar_prefetch = 0 : i64, scratch_operands = 0 : i64, tpu.core_type = #tpu.core_type<tc>, window_params = [{transform_indices = @transform_0, window_bounds = array<i64: 512, 27>}, {pipeline_mode = #tpu.pipeline_mode<synchronous>, transform_indices = @transform_1, window_bounds = array<i64: 27, 32>}, {pipeline_mode = #tpu.pipeline_mode<synchronous>, transform_indices = @transform_2, window_bounds = array<i64: 1, 32>}, {transform_indices = @transform_3, window_bounds = array<i64: 512, 32>}]} {
    %c0 = arith.constant 0 : index
    %c0_0 = arith.constant 0 : index
    %0 = vector.load %arg1[%c0, %c0_0] : memref<512x27xbf16, #tpu.memory_space<vmem>>, vector<512x27xbf16>
    %c0_1 = arith.constant 0 : index
    %c0_2 = arith.constant 0 : index
    %1 = vector.load %arg2[%c0_1, %c0_2] : memref<27x32xbf16, #tpu.memory_space<vmem>>, vector<27x32xbf16>
    %cst = arith.constant dense<0.000000e+00> : vector<512x32xf32>
    %2 = tpu.matmul %0, %1, %cst {dimension_numbers = #tpu.dot_dimension_numbers<[1], [0], [0], [1], [0, 0, 1, 1], [], []>} : vector<512x27xbf16>, vector<27x32xbf16>, vector<512x32xf32> -> vector<512x32xf32>
    %c0_3 = arith.constant 0 : index
    %c0_4 = arith.constant 0 : index
    %3 = vector.load %arg3[%c0_3, %c0_4] : memref<1x32xf32, #tpu.memory_space<vmem>>, vector<1x32xf32>
    %4 = vector.broadcast %3 : vector<1x32xf32> to vector<512x32xf32>
    %5 = arith.addf %2, %4 : vector<512x32xf32>
    %cst_5 = arith.constant 0.000000e+00 : f32
    %6 = vector.broadcast %cst_5 : f32 to vector<512x32xf32>
    %7 = arith.maximumf %5, %6 : vector<512x32xf32>
    %8 = arith.truncf %7 : vector<512x32xf32> to vector<512x32xbf16>
    %c0_6 = arith.constant 0 : index
    %c0_7 = arith.constant 0 : index
    %9 = vector.load %arg4[%c0_6, %c0_7] : memref<512x32xbf16, #tpu.memory_space<vmem>>, vector<512x32xbf16>
    tpu.vector_store %arg4[%c0_6, %c0_7], %8 {strides = array<i32>} : memref<512x32xbf16, #tpu.memory_space<vmem>>, vector<512x32xbf16>,
    return
  }
  func.func @transform_0(%arg0: i32) -> (i32, i32) {
    %c0_i32 = arith.constant 0 : i32
    %c0_i32_0 = arith.constant 0 : i32
    return %arg0, %c0_i32 : i32, i32
  }
  func.func @transform_1(%arg0: i32) -> (i32, i32) {
    %c0_i32 = arith.constant 0 : i32
    %c0_i32_0 = arith.constant 0 : i32
    %c0_i32_1 = arith.constant 0 : i32
    return %c0_i32, %c0_i32_0 : i32, i32
  }
  func.func @transform_2(%arg0: i32) -> (i32, i32) {
    %c0_i32 = arith.constant 0 : i32
    %c0_i32_0 = arith.constant 0 : i32
    %c0_i32_1 = arith.constant 0 : i32
    return %c0_i32, %c0_i32_0 : i32, i32
  }
  func.func @transform_3(%arg0: i32) -> (i32, i32) {
    %c0_i32 = arith.constant 0 : i32
    %c0_i32_0 = arith.constant 0 : i32
    return %arg0, %c0_i32 : i32, i32
  }
}

</mosaic_0001>

<bundles_post_ra>
// kernel: tpu_custom_call.1
= control target key start
LH: loop header
LB: loop body
LE: loop exit
PB: predicated region body
PF: predicated region fallthrough
CT: control target
= control target key end

     0   :  { %vm358_vm0 = vcmask 1044480   ;;  %vm359_vm1 = vcmask 1045504   ;;  %vm261_vm2 = vcmask 220160   ;;  %v1379_v1 = vmov 65535   ;;  %s1859_s1 = inlined_call_operand.vmem [shape: bf16[27,32], index: 1, kind: input, shape index: {}]   ;;  %s1860_s0 = inlined_call_operand.vmem [shape: bf16[512,27], index: 0, kind: input, shape index: {}]   ;;  %s1861_s2 = inlined_call_operand.vmem [shape: f32[1,32], index: 2, kind: input, shape index: {}]   ;;  %s1862_s3 = inlined_call_operand.vmem [shape: bf16[512,32], index: 3, kind: output, shape index: {}]  }
   0x1   :  { %v1345_v0 = vld [vmem:[%s1859_s1] sm:$0xff]   ;;  %v360_v2 = vsel %vm358_vm0, 4294967295, %v1379_v1  ;;  %v1346_v3 = vld [vmem:[%s1859_s1 + $0x8] sm:$0x3f]   ;;  %v1351_v10 = vld [vmem:[%s1860_s0 + $0x10] sm:$0xff]   ;;  %vm974_vm3 = vcmask 257024  }
   0x2   :  { %1272 = vmatprep.subr.bf16.mxu0 %v1345_v0  ;;  %1340 = vmatprep.subr.bf16.mxu1 %v1345_v0  ;;  %v361_v4 = vsel %vm359_vm1, %v360_v2, 0  ;;  %v1347_v5 = vld [vmem:[%s1860_s0] sm:$0xff]   ;;  %v1349_v8 = vld [vmem:[%s1860_s0 + $0x8] sm:$0xff]   ;;  %v1352_v11 = vld [vmem:[%s1860_s0 + $0x90] sm:$0xff]  }
   0x3   :  { %1273 = vmatpush3.bf16.msra.mxu0 %v1345_v0  ;;  %1342 = vmatpush3.bf16.msra.mxu1 %v1345_v0  ;;  %v363_v6 = vand.u32 %v1346_v3, %v361_v4  ;;  %v1348_v7 = vld [vmem:[%s1860_s0 + $0x80] sm:$0xff]   ;;  %v1350_v9 = vld [vmem:[%s1860_s0 + $0x88] sm:$0xff]   ;;  %v1353_v12 = vld [vmem:[%s1860_s0 + $0x18] sm:$0xff]  }
   0x4   :  { %1276 = vmatprep.mubr.msk.bf16.mxu0 %vm261_vm2, %v1347_v5  ;;  %1308 = vmatprep.mubr.msk.bf16.mxu1 %vm261_vm2, %v1348_v7  ;;  %v1354_v13 = vld [vmem:[%s1860_s0 + $0x98] sm:$0xff]   ;;  %v1355_v14 = vld [vmem:[%s1860_s0 + $0x20] sm:$0xff]   ;;  %v1357_v16 = vld [vmem:[%s1860_s0 + $0x28] sm:$0xff]  }
   0x5   :  { %1274 = vmatprep.subr.bf16.mxu0 %v363_v6  ;;  %1341 = vmatprep.subr.bf16.mxu1 %v363_v6  ;;  %v1356_v15 = vld [vmem:[%s1860_s0 + $0xa0] sm:$0xff]   ;;  %v1358_v17 = vld [vmem:[%s1860_s0 + $0xa8] sm:$0xff]   ;;  %v1359_v18 = vld [vmem:[%s1860_s0 + $0x30] sm:$0xff]  }
   0x6   :  { %v1360_v19 = vld [vmem:[%s1860_s0 + $0xb0] sm:$0xff]   ;;  %v1361_v20 = vld [vmem:[%s1860_s0 + $0x38] sm:$0xff]   ;;  %v1363_v22 = vld [vmem:[%s1860_s0 + $0x40] sm:$0xff]  }
   0x7   :  { %1275 = vmatpush3.bf16.msra.mxu0 %v363_v6  ;;  %1343 = vmatpush3.bf16.msra.mxu1 %v363_v6  ;;  %v1362_v21 = vld [vmem:[%s1860_s0 + $0xb8] sm:$0xff]   ;;  %v1364_v23 = vld [vmem:[%s1860_s0 + $0xc0] sm:$0xff]   ;;  %v1365_v24 = vld [vmem:[%s1860_s0 + $0x48] sm:$0xff]  }
   0x8   :  { %v1366_v25 = vld [vmem:[%s1860_s0 + $0xc8] sm:$0xff]   ;;  %v1367_v26 = vld [vmem:[%s1860_s0 + $0x50] sm:$0xff]   ;;  %v1369_v28 = vld [vmem:[%s1860_s0 + $0x58] sm:$0xff]  }
   0x9   :  { %v1368_v27 = vld [vmem:[%s1860_s0 + $0xd0] sm:$0xff]   ;;  %v1370_v29 = vld [vmem:[%s1860_s0 + $0xd8] sm:$0xff]   ;;  %v1371_v30 = vld [vmem:[%s1860_s0 + $0x60] sm:$0xff]  }
   0xa   :  { %1277 = vmatmul.mubr.msk.bf16.vlgmr.msra.gmra.mrb[0].mxu0 %vm261_vm2, %v1349_v8  ;;  %1309 = vmatmul.mubr.msk.bf16.vlgmr.msra.gmra.mrb[0].mxu1 %vm261_vm2, %v1350_v9  ;;  %v1372_v31 = vld [vmem:[%s1860_s0 + $0xe0] sm:$0xff]   ;;  %v1373_v32 = vld [vmem:[%s1860_s0 + $0x68] sm:$0xff]   ;;  %v1375_v34 = vld [vmem:[%s1860_s0 + $0x70] sm:$0xff]  }
   0xb   :  { %1280 = vmatprep.mubr.msk.bf16.mxu0 %vm261_vm2, %v1351_v10  ;;  %1312 = vmatprep.mubr.msk.bf16.mxu1 %vm261_vm2, %v1352_v11  ;;  %v1374_v33 = vld [vmem:[%s1860_s0 + $0xe8] sm:$0xff]   ;;  %v1376_v35 = vld [vmem:[%s1860_s0 + $0xf0] sm:$0xff]   ;;  %v1377_v36 = vld [vmem:[%s1860_s0 + $0x78] sm:$0xff]  }
   0xc   :  { %v1378_v37 = vld [vmem:[%s1860_s0 + $0xf8] sm:$0xff]   ;;  %v1537_v38 = vld [vmem:[%s1861_s2] ss:$0 sm:$0xff] }
  0x12   :  { %1281 = vmatmul.mubr.msk.bf16.gmra.mrb[4].mxu0 %vm261_vm2, %v1353_v12  ;;  %1313 = vmatmul.mubr.msk.bf16.gmra.mrb[4].mxu1 %vm261_vm2, %v1354_v13 }
  0x13   :  { %1284 = vmatprep.mubr.msk.bf16.mxu0 %vm261_vm2, %v1355_v14  ;;  %1316 = vmatprep.mubr.msk.bf16.mxu1 %vm261_vm2, %v1356_v15 }
  0x1a   :  { %1285 = vmatmul.mubr.msk.bf16.gmra.mrb[8].mxu0 %vm261_vm2, %v1357_v16  ;;  %1317 = vmatmul.mubr.msk.bf16.gmra.mrb[8].mxu1 %vm261_vm2, %v1358_v17 }
  0x1b   :  { %1288 = vmatprep.mubr.msk.bf16.mxu0 %vm261_vm2, %v1359_v18  ;;  %1320 = vmatprep.mubr.msk.bf16.mxu1 %vm261_vm2, %v1360_v19 }
  0x22   :  { %1289 = vmatmul.mubr.msk.bf16.gmra.mrb[12].mxu0 %vm261_vm2, %v1361_v20  ;;  %1321 = vmatmul.mubr.msk.bf16.gmra.mrb[12].mxu1 %vm261_vm2, %v1362_v21 }
  0x23   :  { %1292 = vmatprep.mubr.msk.bf16.mxu0 %vm261_vm2, %v1363_v22  ;;  %1324 = vmatprep.mubr.msk.bf16.mxu1 %vm261_vm2, %v1364_v23 }
  0x2a   :  { %1293 = vmatmul.mubr.msk.bf16.gmra.mrb[16].mxu0 %vm261_vm2, %v1365_v24  ;;  %1325 = vmatmul.mubr.msk.bf16.gmra.mrb[16].mxu1 %vm261_vm2, %v1366_v25 }
  0x2b   :  { %1296 = vmatprep.mubr.msk.bf16.mxu0 %vm261_vm2, %v1367_v26  ;;  %1328 = vmatprep.mubr.msk.bf16.mxu1 %vm261_vm2, %v1368_v27 }
  0x32   :  { %1297 = vmatmul.mubr.msk.bf16.gmra.mrb[20].mxu0 %vm261_vm2, %v1369_v28  ;;  %1329 = vmatmul.mubr.msk.bf16.gmra.mrb[20].mxu1 %vm261_vm2, %v1370_v29 }
  0x33   :  { %1300 = vmatprep.mubr.msk.bf16.mxu0 %vm261_vm2, %v1371_v30  ;;  %1332 = vmatprep.mubr.msk.bf16.mxu1 %vm261_vm2, %v1372_v31 }
  0x3a   :  { %1301 = vmatmul.mubr.msk.bf16.gmra.mrb[24].mxu0 %vm261_vm2, %v1373_v32  ;;  %1333 = vmatmul.mubr.msk.bf16.gmra.mrb[24].mxu1 %vm261_vm2, %v1374_v33 }
  0x3b   :  { %1304 = vmatprep.mubr.msk.bf16.mxu0 %vm261_vm2, %v1375_v34  ;;  %1336 = vmatprep.mubr.msk.bf16.mxu1 %vm261_vm2, %v1376_v35 }
  0x42   :  { %1305 = vmatmul.mubr.msk.bf16.gmra.mrb[28].mxu0 %vm261_vm2, %v1377_v36  ;;  %1337 = vmatmul.mubr.msk.bf16.gmra.mrb[28].mxu1 %vm261_vm2, %v1378_v37 }
  0xdd   :  { %v1278_v39 = vpop.f32.mrb[0].mxu0  ;;  %v1310_v40 = vpop.f32.mrb[0].mxu1 }
  0xde   :  { %v408_v41 = vadd.f32 %v1278_v39, %v1537_v38  ;;  %v536_v42 = vadd.f32 %v1310_v40, %v1537_v38  ;;  %v399_v43 = vpop.f32.mrb[1].mxu0  ;;  %v527_v44 = vpop.f32.mrb[1].mxu1 }
  0xdf   :  { %v400_v45 = vadd.f32 %v1537_v38, %v399_v43  ;;  %v528_v46 = vadd.f32 %v1537_v38, %v527_v44  ;;  %v1279_v47 = vpop.f32.mrb[2].mxu0  ;;  %v1311_v48 = vpop.f32.mrb[2].mxu1 }
  0xe0   :  { %v656_v49 = vmax.f32 %v408_v41, 0.0  ;;  %v688_v50 = vmax.f32 %v536_v42, 0.0  ;;  %v411_v51 = vadd.f32 %v1279_v47, %v1537_v38  ;;  %v539_v52 = vadd.f32 %v1311_v48, %v1537_v38  ;;  %v402_v53 = vpop.f32.mrb[3].mxu0  ;;  %v530_v54 = vpop.f32.mrb[3].mxu1 }
  0xe1   :  { %v654_v55 = vmax.f32 %v400_v45, 0.0  ;;  %v686_v56 = vmax.f32 %v528_v46, 0.0  ;;  %v403_v57 = vadd.f32 %v1537_v38, %v402_v53  ;;  %v531_v58 = vadd.f32 %v1537_v38, %v530_v54 }
  0xe2   :  { %v1176_v59 = vpack.c.bf16 %v656_v49, %v656_v49  ;;  %v1208_v60 = vpack.c.bf16 %v688_v50, %v688_v50  ;;  %v657_v61 = vmax.f32 %v411_v51, 0.0  ;;  %v689_v62 = vmax.f32 %v539_v52, 0.0 }
  0xe3   :  { %v1174_v63 = vpack.c.bf16 %v654_v55, %v654_v55  ;;  %v1206_v0 = vpack.c.bf16 %v686_v56, %v686_v56  ;;  %v655_v1 = vmax.f32 %v403_v57, 0.0  ;;  %v687_v2 = vmax.f32 %v531_v58, 0.0 }
  0xe4   :  { %977 = vst.msk [vmem:[%s1862_s3 + $0x8] sm:$0xf] %vm974_vm3, %v1176_v59  ;;  %1009 = vst.msk [vmem:[%s1862_s3 + $0x88] sm:$0xf] %vm974_vm3, %v1208_v60  ;;  %v1177_v3 = vpack.c.bf16 %v657_v61, %v657_v61  ;;  %v1209_v4 = vpack.c.bf16 %v689_v62, %v689_v62 }
  0xe5   :  { %975 = vst.msk [vmem:[%s1862_s3] sm:$0xf] %vm974_vm3, %v1174_v63  ;;  %1007 = vst.msk [vmem:[%s1862_s3 + $0x80] sm:$0xf] %vm974_vm3, %v1206_v0  ;;  %v1175_v5 = vpack.c.bf16 %v655_v1, %v655_v1  ;;  %v1207_v6 = vpack.c.bf16 %v687_v2, %v687_v2  ;;  %v1282_v7 = vpop.f32.mrb[4].mxu0  ;;  %v1314_v8 = vpop.f32.mrb[4].mxu1 }
  0xe6   :  { %978 = vst.msk [vmem:[%s1862_s3 + $0xc] sm:$0xf] %vm974_vm3, %v1177_v3  ;;  %1010 = vst.msk [vmem:[%s1862_s3 + $0x8c] sm:$0xf] %vm974_vm3, %v1209_v4  ;;  %v424_v9 = vadd.f32 %v1282_v7, %v1537_v38  ;;  %v552_v10 = vadd.f32 %v1314_v8, %v1537_v38  ;;  %v415_v11 = vpop.f32.mrb[5].mxu0  ;;  %v543_v12 = vpop.f32.mrb[5].mxu1 }
  0xe7   :  { %976 = vst.msk [vmem:[%s1862_s3 + $0x4] sm:$0xf] %vm974_vm3, %v1175_v5  ;;  %1008 = vst.msk [vmem:[%s1862_s3 + $0x84] sm:$0xf] %vm974_vm3, %v1207_v6  ;;  %v416_v13 = vadd.f32 %v1537_v38, %v415_v11  ;;  %v544_v14 = vadd.f32 %v1537_v38, %v543_v12  ;;  %v1283_v15 = vpop.f32.mrb[6].mxu0  ;;  %v1315_v16 = vpop.f32.mrb[6].mxu1 }
  0xe8   :  { %v660_v17 = vmax.f32 %v424_v9, 0.0  ;;  %v692_v18 = vmax.f32 %v552_v10, 0.0  ;;  %v427_v19 = vadd.f32 %v1283_v15, %v1537_v38  ;;  %v555_v20 = vadd.f32 %v1315_v16, %v1537_v38  ;;  %v418_v21 = vpop.f32.mrb[7].mxu0  ;;  %v546_v22 = vpop.f32.mrb[7].mxu1 }
  0xe9   :  { %v658_v23 = vmax.f32 %v416_v13, 0.0  ;;  %v690_v24 = vmax.f32 %v544_v14, 0.0  ;;  %v419_v25 = vadd.f32 %v1537_v38, %v418_v21  ;;  %v547_v26 = vadd.f32 %v1537_v38, %v546_v22 }
  0xea   :  { %v1180_v27 = vpack.c.bf16 %v660_v17, %v660_v17  ;;  %v1212_v28 = vpack.c.bf16 %v692_v18, %v692_v18  ;;  %v661_v29 = vmax.f32 %v427_v19, 0.0  ;;  %v693_v30 = vmax.f32 %v555_v20, 0.0 }
  0xeb   :  { %v1178_v31 = vpack.c.bf16 %v658_v23, %v658_v23  ;;  %v1210_v32 = vpack.c.bf16 %v690_v24, %v690_v24  ;;  %v659_v33 = vmax.f32 %v419_v25, 0.0  ;;  %v691_v34 = vmax.f32 %v547_v26, 0.0 }
  0xec   :  { %981 = vst.msk [vmem:[%s1862_s3 + $0x18] sm:$0xf] %vm974_vm3, %v1180_v27  ;;  %1013 = vst.msk [vmem:[%s1862_s3 + $0x98] sm:$0xf] %vm974_vm3, %v1212_v28  ;;  %v1181_v35 = vpack.c.bf16 %v661_v29, %v661_v29  ;;  %v1213_v36 = vpack.c.bf16 %v693_v30, %v693_v30 }
  0xed   :  { %979 = vst.msk [vmem:[%s1862_s3 + $0x10] sm:$0xf] %vm974_vm3, %v1178_v31  ;;  %1011 = vst.msk [vmem:[%s1862_s3 + $0x90] sm:$0xf] %vm974_vm3, %v1210_v32  ;;  %v1179_v37 = vpack.c.bf16 %v659_v33, %v659_v33  ;;  %v1211_v39 = vpack.c.bf16 %v691_v34, %v691_v34  ;;  %v1286_v40 = vpop.f32.mrb[8].mxu0  ;;  %v1318_v41 = vpop.f32.mrb[8].mxu1 }
  0xee   :  { %982 = vst.msk [vmem:[%s1862_s3 + $0x1c] sm:$0xf] %vm974_vm3, %v1181_v35  ;;  %1014 = vst.msk [vmem:[%s1862_s3 + $0x9c] sm:$0xf] %vm974_vm3, %v1213_v36  ;;  %v440_v42 = vadd.f32 %v1286_v40, %v1537_v38  ;;  %v568_v43 = vadd.f32 %v1318_v41, %v1537_v38  ;;  %v431_v44 = vpop.f32.mrb[9].mxu0  ;;  %v559_v45 = vpop.f32.mrb[9].mxu1 }
  0xef   :  { %980 = vst.msk [vmem:[%s1862_s3 + $0x14] sm:$0xf] %vm974_vm3, %v1179_v37  ;;  %1012 = vst.msk [vmem:[%s1862_s3 + $0x94] sm:$0xf] %vm974_vm3, %v1211_v39  ;;  %v432_v46 = vadd.f32 %v1537_v38, %v431_v44  ;;  %v560_v47 = vadd.f32 %v1537_v38, %v559_v45  ;;  %v1287_v48 = vpop.f32.mrb[10].mxu0  ;;  %v1319_v49 = vpop.f32.mrb[10].mxu1 }
  0xf0   :  { %v664_v50 = vmax.f32 %v440_v42, 0.0  ;;  %v696_v51 = vmax.f32 %v568_v43, 0.0  ;;  %v443_v52 = vadd.f32 %v1287_v48, %v1537_v38  ;;  %v571_v53 = vadd.f32 %v1319_v49, %v1537_v38  ;;  %v434_v54 = vpop.f32.mrb[11].mxu0  ;;  %v562_v55 = vpop.f32.mrb[11].mxu1 }
  0xf1   :  { %v662_v56 = vmax.f32 %v432_v46, 0.0  ;;  %v694_v57 = vmax.f32 %v560_v47, 0.0  ;;  %v435_v58 = vadd.f32 %v1537_v38, %v434_v54  ;;  %v563_v59 = vadd.f32 %v1537_v38, %v562_v55 }
  0xf2   :  { %v1184_v60 = vpack.c.bf16 %v664_v50, %v664_v50  ;;  %v1216_v61 = vpack.c.bf16 %v696_v51, %v696_v51  ;;  %v665_v62 = vmax.f32 %v443_v52, 0.0  ;;  %v697_v63 = vmax.f32 %v571_v53, 0.0 }
  0xf3   :  { %v1182_v0 = vpack.c.bf16 %v662_v56, %v662_v56  ;;  %v1214_v1 = vpack.c.bf16 %v694_v57, %v694_v57  ;;  %v663_v2 = vmax.f32 %v435_v58, 0.0  ;;  %v695_v3 = vmax.f32 %v563_v59, 0.0 }
  0xf4   :  { %985 = vst.msk [vmem:[%s1862_s3 + $0x28] sm:$0xf] %vm974_vm3, %v1184_v60  ;;  %1017 = vst.msk [vmem:[%s1862_s3 + $0xa8] sm:$0xf] %vm974_vm3, %v1216_v61  ;;  %v1185_v4 = vpack.c.bf16 %v665_v62, %v665_v62  ;;  %v1217_v5 = vpack.c.bf16 %v697_v63, %v697_v63 }
  0xf5   :  { %983 = vst.msk [vmem:[%s1862_s3 + $0x20] sm:$0xf] %vm974_vm3, %v1182_v0  ;;  %1015 = vst.msk [vmem:[%s1862_s3 + $0xa0] sm:$0xf] %vm974_vm3, %v1214_v1  ;;  %v1183_v6 = vpack.c.bf16 %v663_v2, %v663_v2  ;;  %v1215_v7 = vpack.c.bf16 %v695_v3, %v695_v3  ;;  %v1290_v8 = vpop.f32.mrb[12].mxu0  ;;  %v1322_v9 = vpop.f32.mrb[12].mxu1 }
  0xf6   :  { %986 = vst.msk [vmem:[%s1862_s3 + $0x2c] sm:$0xf] %vm974_vm3, %v1185_v4  ;;  %1018 = vst.msk [vmem:[%s1862_s3 + $0xac] sm:$0xf] %vm974_vm3, %v1217_v5  ;;  %v456_v10 = vadd.f32 %v1290_v8, %v1537_v38  ;;  %v584_v11 = vadd.f32 %v1322_v9, %v1537_v38  ;;  %v447_v12 = vpop.f32.mrb[13].mxu0  ;;  %v575_v13 = vpop.f32.mrb[13].mxu1 }
  0xf7   :  { %984 = vst.msk [vmem:[%s1862_s3 + $0x24] sm:$0xf] %vm974_vm3, %v1183_v6  ;;  %1016 = vst.msk [vmem:[%s1862_s3 + $0xa4] sm:$0xf] %vm974_vm3, %v1215_v7  ;;  %v448_v14 = vadd.f32 %v1537_v38, %v447_v12  ;;  %v576_v15 = vadd.f32 %v1537_v38, %v575_v13  ;;  %v1291_v16 = vpop.f32.mrb[14].mxu0  ;;  %v1323_v17 = vpop.f32.mrb[14].mxu1 }
  0xf8   :  { %v668_v18 = vmax.f32 %v456_v10, 0.0  ;;  %v700_v19 = vmax.f32 %v584_v11, 0.0  ;;  %v459_v20 = vadd.f32 %v1291_v16, %v1537_v38  ;;  %v587_v21 = vadd.f32 %v1323_v17, %v1537_v38  ;;  %v450_v22 = vpop.f32.mrb[15].mxu0  ;;  %v578_v23 = vpop.f32.mrb[15].mxu1 }
  0xf9   :  { %v666_v24 = vmax.f32 %v448_v14, 0.0  ;;  %v698_v25 = vmax.f32 %v576_v15, 0.0  ;;  %v451_v26 = vadd.f32 %v1537_v38, %v450_v22  ;;  %v579_v27 = vadd.f32 %v1537_v38, %v578_v23 }
  0xfa   :  { %v1188_v28 = vpack.c.bf16 %v668_v18, %v668_v18  ;;  %v1220_v29 = vpack.c.bf16 %v700_v19, %v700_v19  ;;  %v669_v30 = vmax.f32 %v459_v20, 0.0  ;;  %v701_v31 = vmax.f32 %v587_v21, 0.0 }
  0xfb   :  { %v1186_v32 = vpack.c.bf16 %v666_v24, %v666_v24  ;;  %v1218_v33 = vpack.c.bf16 %v698_v25, %v698_v25  ;;  %v667_v34 = vmax.f32 %v451_v26, 0.0  ;;  %v699_v35 = vmax.f32 %v579_v27, 0.0 }
  0xfc   :  { %989 = vst.msk [vmem:[%s1862_s3 + $0x38] sm:$0xf] %vm974_vm3, %v1188_v28  ;;  %1021 = vst.msk [vmem:[%s1862_s3 + $0xb8] sm:$0xf] %vm974_vm3, %v1220_v29  ;;  %v1189_v36 = vpack.c.bf16 %v669_v30, %v669_v30  ;;  %v1221_v37 = vpack.c.bf16 %v701_v31, %v701_v31 }
  0xfd   :  { %987 = vst.msk [vmem:[%s1862_s3 + $0x30] sm:$0xf] %vm974_vm3, %v1186_v32  ;;  %1019 = vst.msk [vmem:[%s1862_s3 + $0xb0] sm:$0xf] %vm974_vm3, %v1218_v33  ;;  %v1187_v39 = vpack.c.bf16 %v667_v34, %v667_v34  ;;  %v1219_v40 = vpack.c.bf16 %v699_v35, %v699_v35  ;;  %v1294_v41 = vpop.f32.mrb[16].mxu0  ;;  %v1326_v42 = vpop.f32.mrb[16].mxu1 }
  0xfe   :  { %990 = vst.msk [vmem:[%s1862_s3 + $0x3c] sm:$0xf] %vm974_vm3, %v1189_v36  ;;  %1022 = vst.msk [vmem:[%s1862_s3 + $0xbc] sm:$0xf] %vm974_vm3, %v1221_v37  ;;  %v472_v43 = vadd.f32 %v1294_v41, %v1537_v38  ;;  %v600_v44 = vadd.f32 %v1326_v42, %v1537_v38  ;;  %v463_v45 = vpop.f32.mrb[17].mxu0  ;;  %v591_v46 = vpop.f32.mrb[17].mxu1 }
  0xff   :  { %988 = vst.msk [vmem:[%s1862_s3 + $0x34] sm:$0xf] %vm974_vm3, %v1187_v39  ;;  %1020 = vst.msk [vmem:[%s1862_s3 + $0xb4] sm:$0xf] %vm974_vm3, %v1219_v40  ;;  %v464_v47 = vadd.f32 %v1537_v38, %v463_v45  ;;  %v592_v48 = vadd.f32 %v1537_v38, %v591_v46  ;;  %v1295_v49 = vpop.f32.mrb[18].mxu0  ;;  %v1327_v50 = vpop.f32.mrb[18].mxu1 }
 0x100   :  { %v672_v51 = vmax.f32 %v472_v43, 0.0  ;;  %v704_v52 = vmax.f32 %v600_v44, 0.0  ;;  %v475_v53 = vadd.f32 %v1295_v49, %v1537_v38  ;;  %v603_v54 = vadd.f32 %v1327_v50, %v1537_v38  ;;  %v466_v55 = vpop.f32.mrb[19].mxu0  ;;  %v594_v56 = vpop.f32.mrb[19].mxu1 }
 0x101   :  { %v670_v57 = vmax.f32 %v464_v47, 0.0  ;;  %v702_v58 = vmax.f32 %v592_v48, 0.0  ;;  %v467_v59 = vadd.f32 %v1537_v38, %v466_v55  ;;  %v595_v60 = vadd.f32 %v1537_v38, %v594_v56 }
 0x102   :  { %v1192_v61 = vpack.c.bf16 %v672_v51, %v672_v51  ;;  %v1224_v62 = vpack.c.bf16 %v704_v52, %v704_v52  ;;  %v673_v63 = vmax.f32 %v475_v53, 0.0  ;;  %v705_v0 = vmax.f32 %v603_v54, 0.0 }
 0x103   :  { %v1190_v1 = vpack.c.bf16 %v670_v57, %v670_v57  ;;  %v1222_v2 = vpack.c.bf16 %v702_v58, %v702_v58  ;;  %v671_v3 = vmax.f32 %v467_v59, 0.0  ;;  %v703_v4 = vmax.f32 %v595_v60, 0.0 }
 0x104   :  { %993 = vst.msk [vmem:[%s1862_s3 + $0x48] sm:$0xf] %vm974_vm3, %v1192_v61  ;;  %1025 = vst.msk [vmem:[%s1862_s3 + $0xc8] sm:$0xf] %vm974_vm3, %v1224_v62  ;;  %v1193_v5 = vpack.c.bf16 %v673_v63, %v673_v63  ;;  %v1225_v6 = vpack.c.bf16 %v705_v0, %v705_v0 }
 0x105   :  { %991 = vst.msk [vmem:[%s1862_s3 + $0x40] sm:$0xf] %vm974_vm3, %v1190_v1  ;;  %1023 = vst.msk [vmem:[%s1862_s3 + $0xc0] sm:$0xf] %vm974_vm3, %v1222_v2  ;;  %v1191_v7 = vpack.c.bf16 %v671_v3, %v671_v3  ;;  %v1223_v8 = vpack.c.bf16 %v703_v4, %v703_v4  ;;  %v1298_v9 = vpop.f32.mrb[20].mxu0  ;;  %v1330_v10 = vpop.f32.mrb[20].mxu1 }
 0x106   :  { %994 = vst.msk [vmem:[%s1862_s3 + $0x4c] sm:$0xf] %vm974_vm3, %v1193_v5  ;;  %1026 = vst.msk [vmem:[%s1862_s3 + $0xcc] sm:$0xf] %vm974_vm3, %v1225_v6  ;;  %v488_v11 = vadd.f32 %v1298_v9, %v1537_v38  ;;  %v616_v12 = vadd.f32 %v1330_v10, %v1537_v38  ;;  %v479_v13 = vpop.f32.mrb[21].mxu0  ;;  %v607_v14 = vpop.f32.mrb[21].mxu1 }
 0x107   :  { %992 = vst.msk [vmem:[%s1862_s3 + $0x44] sm:$0xf] %vm974_vm3, %v1191_v7  ;;  %1024 = vst.msk [vmem:[%s1862_s3 + $0xc4] sm:$0xf] %vm974_vm3, %v1223_v8  ;;  %v480_v15 = vadd.f32 %v1537_v38, %v479_v13  ;;  %v608_v16 = vadd.f32 %v1537_v38, %v607_v14  ;;  %v1299_v17 = vpop.f32.mrb[22].mxu0  ;;  %v1331_v18 = vpop.f32.mrb[22].mxu1 }
 0x108   :  { %v676_v19 = vmax.f32 %v488_v11, 0.0  ;;  %v708_v20 = vmax.f32 %v616_v12, 0.0  ;;  %v491_v21 = vadd.f32 %v1299_v17, %v1537_v38  ;;  %v619_v22 = vadd.f32 %v1331_v18, %v1537_v38  ;;  %v482_v23 = vpop.f32.mrb[23].mxu0  ;;  %v610_v24 = vpop.f32.mrb[23].mxu1 }
 0x109   :  { %v674_v25 = vmax.f32 %v480_v15, 0.0  ;;  %v706_v26 = vmax.f32 %v608_v16, 0.0  ;;  %v483_v27 = vadd.f32 %v1537_v38, %v482_v23  ;;  %v611_v28 = vadd.f32 %v1537_v38, %v610_v24 }
 0x10a   :  { %v1196_v29 = vpack.c.bf16 %v676_v19, %v676_v19  ;;  %v1228_v30 = vpack.c.bf16 %v708_v20, %v708_v20  ;;  %v677_v31 = vmax.f32 %v491_v21, 0.0  ;;  %v709_v32 = vmax.f32 %v619_v22, 0.0 }
 0x10b   :  { %v1194_v33 = vpack.c.bf16 %v674_v25, %v674_v25  ;;  %v1226_v34 = vpack.c.bf16 %v706_v26, %v706_v26  ;;  %v675_v35 = vmax.f32 %v483_v27, 0.0  ;;  %v707_v36 = vmax.f32 %v611_v28, 0.0 }
 0x10c   :  { %997 = vst.msk [vmem:[%s1862_s3 + $0x58] sm:$0xf] %vm974_vm3, %v1196_v29  ;;  %1029 = vst.msk [vmem:[%s1862_s3 + $0xd8] sm:$0xf] %vm974_vm3, %v1228_v30  ;;  %v1197_v37 = vpack.c.bf16 %v677_v31, %v677_v31  ;;  %v1229_v39 = vpack.c.bf16 %v709_v32, %v709_v32 }
 0x10d   :  { %995 = vst.msk [vmem:[%s1862_s3 + $0x50] sm:$0xf] %vm974_vm3, %v1194_v33  ;;  %1027 = vst.msk [vmem:[%s1862_s3 + $0xd0] sm:$0xf] %vm974_vm3, %v1226_v34  ;;  %v1195_v40 = vpack.c.bf16 %v675_v35, %v675_v35  ;;  %v1227_v41 = vpack.c.bf16 %v707_v36, %v707_v36  ;;  %v1302_v42 = vpop.f32.mrb[24].mxu0  ;;  %v1334_v43 = vpop.f32.mrb[24].mxu1 }
 0x10e   :  { %998 = vst.msk [vmem:[%s1862_s3 + $0x5c] sm:$0xf] %vm974_vm3, %v1197_v37  ;;  %1030 = vst.msk [vmem:[%s1862_s3 + $0xdc] sm:$0xf] %vm974_vm3, %v1229_v39  ;;  %v504_v44 = vadd.f32 %v1302_v42, %v1537_v38  ;;  %v632_v45 = vadd.f32 %v1334_v43, %v1537_v38  ;;  %v495_v46 = vpop.f32.mrb[25].mxu0  ;;  %v623_v47 = vpop.f32.mrb[25].mxu1 }
 0x10f   :  { %996 = vst.msk [vmem:[%s1862_s3 + $0x54] sm:$0xf] %vm974_vm3, %v1195_v40  ;;  %1028 = vst.msk [vmem:[%s1862_s3 + $0xd4] sm:$0xf] %vm974_vm3, %v1227_v41  ;;  %v496_v48 = vadd.f32 %v1537_v38, %v495_v46  ;;  %v624_v49 = vadd.f32 %v1537_v38, %v623_v47  ;;  %v1303_v50 = vpop.f32.mrb[26].mxu0  ;;  %v1335_v51 = vpop.f32.mrb[26].mxu1 }
 0x110   :  { %v680_v52 = vmax.f32 %v504_v44, 0.0  ;;  %v712_v53 = vmax.f32 %v632_v45, 0.0  ;;  %v507_v54 = vadd.f32 %v1303_v50, %v1537_v38  ;;  %v635_v55 = vadd.f32 %v1335_v51, %v1537_v38  ;;  %v498_v56 = vpop.f32.mrb[27].mxu0  ;;  %v626_v57 = vpop.f32.mrb[27].mxu1 }
 0x111   :  { %v678_v58 = vmax.f32 %v496_v48, 0.0  ;;  %v710_v59 = vmax.f32 %v624_v49, 0.0  ;;  %v499_v60 = vadd.f32 %v1537_v38, %v498_v56  ;;  %v627_v61 = vadd.f32 %v1537_v38, %v626_v57 }
 0x112   :  { %v1200_v62 = vpack.c.bf16 %v680_v52, %v680_v52  ;;  %v1232_v63 = vpack.c.bf16 %v712_v53, %v712_v53  ;;  %v681_v0 = vmax.f32 %v507_v54, 0.0  ;;  %v713_v1 = vmax.f32 %v635_v55, 0.0 }
 0x113   :  { %v1198_v2 = vpack.c.bf16 %v678_v58, %v678_v58  ;;  %v1230_v3 = vpack.c.bf16 %v710_v59, %v710_v59  ;;  %v679_v4 = vmax.f32 %v499_v60, 0.0  ;;  %v711_v5 = vmax.f32 %v627_v61, 0.0 }
 0x114   :  { %1001 = vst.msk [vmem:[%s1862_s3 + $0x68] sm:$0xf] %vm974_vm3, %v1200_v62  ;;  %1033 = vst.msk [vmem:[%s1862_s3 + $0xe8] sm:$0xf] %vm974_vm3, %v1232_v63  ;;  %v1201_v6 = vpack.c.bf16 %v681_v0, %v681_v0  ;;  %v1233_v7 = vpack.c.bf16 %v713_v1, %v713_v1 }
 0x115   :  { %999 = vst.msk [vmem:[%s1862_s3 + $0x60] sm:$0xf] %vm974_vm3, %v1198_v2  ;;  %1031 = vst.msk [vmem:[%s1862_s3 + $0xe0] sm:$0xf] %vm974_vm3, %v1230_v3  ;;  %v1199_v8 = vpack.c.bf16 %v679_v4, %v679_v4  ;;  %v1231_v9 = vpack.c.bf16 %v711_v5, %v711_v5  ;;  %v1306_v10 = vpop.f32.mrb[28].mxu0  ;;  %v1338_v11 = vpop.f32.mrb[28].mxu1 }
 0x116   :  { %1002 = vst.msk [vmem:[%s1862_s3 + $0x6c] sm:$0xf] %vm974_vm3, %v1201_v6  ;;  %1034 = vst.msk [vmem:[%s1862_s3 + $0xec] sm:$0xf] %vm974_vm3, %v1233_v7  ;;  %v520_v12 = vadd.f32 %v1306_v10, %v1537_v38  ;;  %v648_v13 = vadd.f32 %v1338_v11, %v1537_v38  ;;  %v511_v14 = vpop.f32.mrb[29].mxu0  ;;  %v639_v15 = vpop.f32.mrb[29].mxu1 }
 0x117   :  { %1000 = vst.msk [vmem:[%s1862_s3 + $0x64] sm:$0xf] %vm974_vm3, %v1199_v8  ;;  %1032 = vst.msk [vmem:[%s1862_s3 + $0xe4] sm:$0xf] %vm974_vm3, %v1231_v9  ;;  %v512_v16 = vadd.f32 %v1537_v38, %v511_v14  ;;  %v640_v17 = vadd.f32 %v1537_v38, %v639_v15  ;;  %v1307_v18 = vpop.f32.mrb[30].mxu0  ;;  %v1339_v19 = vpop.f32.mrb[30].mxu1 }
 0x118   :  { %v684_v20 = vmax.f32 %v520_v12, 0.0  ;;  %v716_v21 = vmax.f32 %v648_v13, 0.0  ;;  %v523_v22 = vadd.f32 %v1307_v18, %v1537_v38  ;;  %v651_v23 = vadd.f32 %v1339_v19, %v1537_v38  ;;  %v514_v24 = vpop.f32.mrb[31].mxu0  ;;  %v642_v25 = vpop.f32.mrb[31].mxu1 }
 0x119   :  { %v682_v26 = vmax.f32 %v512_v16, 0.0  ;;  %v714_v27 = vmax.f32 %v640_v17, 0.0  ;;  %v515_v28 = vadd.f32 %v1537_v38, %v514_v24  ;;  %v643_v29 = vadd.f32 %v1537_v38, %v642_v25 }
 0x11a   :  { %v1204_v30 = vpack.c.bf16 %v684_v20, %v684_v20  ;;  %v1236_v31 = vpack.c.bf16 %v716_v21, %v716_v21  ;;  %v685_v32 = vmax.f32 %v523_v22, 0.0  ;;  %v717_v33 = vmax.f32 %v651_v23, 0.0 }
 0x11b   :  { %v1202_v34 = vpack.c.bf16 %v682_v26, %v682_v26  ;;  %v1234_v35 = vpack.c.bf16 %v714_v27, %v714_v27  ;;  %v683_v36 = vmax.f32 %v515_v28, 0.0  ;;  %v715_v37 = vmax.f32 %v643_v29, 0.0 }
 0x11c   :  { %1005 = vst.msk [vmem:[%s1862_s3 + $0x78] sm:$0xf] %vm974_vm3, %v1204_v30  ;;  %1037 = vst.msk [vmem:[%s1862_s3 + $0xf8] sm:$0xf] %vm974_vm3, %v1236_v31  ;;  %v1205_v39 = vpack.c.bf16 %v685_v32, %v685_v32  ;;  %v1237_v38 = vpack.c.bf16 %v717_v33, %v717_v33 }
 0x11d   :  { %1003 = vst.msk [vmem:[%s1862_s3 + $0x70] sm:$0xf] %vm974_vm3, %v1202_v34  ;;  %1035 = vst.msk [vmem:[%s1862_s3 + $0xf0] sm:$0xf] %vm974_vm3, %v1234_v35  ;;  %v1203_v40 = vpack.c.bf16 %v683_v36, %v683_v36  ;;  %v1235_v41 = vpack.c.bf16 %v715_v37, %v715_v37 }
 0x11e   :  { %1006 = vst.msk [vmem:[%s1862_s3 + $0x7c] sm:$0xf] %vm974_vm3, %v1205_v39  ;;  %1038 = vst.msk [vmem:[%s1862_s3 + $0xfc] sm:$0xf] %vm974_vm3, %v1237_v38 }
 0x11f   :  { %1004 = vst.msk [vmem:[%s1862_s3 + $0x74] sm:$0xf] %vm974_vm3, %v1203_v40  ;;  %1036 = vst.msk [vmem:[%s1862_s3 + $0xf4] sm:$0xf] %vm974_vm3, %v1235_v41 }

</bundles_post_ra>
